<compile_context>
chip_gen: v7x
topology: tpu7x:2x2x1
jax: 0.10.0
libtpu: 0.0.40
codegen_flags: <defaults>
</compile_context>

<pallas_src>
import functools

import jax
import jax.numpy as jnp
from jax.experimental import pallas as pl
from jax.experimental.pallas import tpu as pltpu


def _round_up(x, m):
    return ((x + m - 1) // m) * m


def _fused_mlp_kernel(*refs, num_layers, sigmoid_output, matmul_dtype):
    """Fused MLP body.

    refs = (x_ref, w0_ref, b0_ref, ..., w{L-1}_ref, b{L-1}_ref, o_ref)
      x_ref : (TM, Kpad0)  bf16      w_l : (Kpad_l, Npad_l)  bf16
      b_l   : (1, Npad_l)  f32       o   : (TM, Npad_{L-1})  f32
    All feature dims are padded to multiples of 128 (lane-dense).
    """
    x_ref = refs[0]
    o_ref = refs[-1]
    wb_refs = refs[1:-1]

    y = x_ref[...]  # bf16 carried activation
    for layer in range(num_layers):  # static unroll: shapes differ per layer
        w_ref = wb_refs[2 * layer]
        b_ref = wb_refs[2 * layer + 1]
        # bf16 operands on the MXU, f32 accumulation.
        acc = jnp.dot(y, w_ref[...], preferred_element_type=jnp.float32)
        z = acc + b_ref[...]  # (1, N) broadcast; f32 epilogue
        if layer < num_layers - 1:
            # Cast the carried activation back to bf16 once per layer.
            y = jnp.maximum(z, 0.0).astype(matmul_dtype)
        else:
            if sigmoid_output:
                z = jax.nn.sigmoid(z)
            o_ref[...] = z.astype(o_ref.dtype)


def fused_mlp(x2d, padded_weights, padded_biases, *, num_layers,
              sigmoid_output, output_dim, matmul_dtype=jnp.bfloat16,
              max_tile_m=512):
    """x2d: (M, K).  padded_weights[l]: (Kpad_l, Npad_l) bf16 (zero-padded,
    torch Linear.weight transposed).  padded_biases[l]: (1, Npad_l) f32."""
    M, K = x2d.shape
    k0 = padded_weights[0].shape[0]
    n_last = padded_weights[-1].shape[1]

    # Row tiling: multiple of 8 sublanes, <= max_tile_m.  When there are
    # enough rows, force >= 2 grid steps so the "parallel" axis can shard
    # across v7x's 2 TensorCores (harmless on single-TC v5e/v6e).
    tm = min(_round_up(max(M, 1), 8), max_tile_m)
    if M >= 16:
        tm = min(tm, _round_up(pl.cdiv(M, 2), 8))
    m_pad = _round_up(max(M, 1), tm)

    # Pad + cast x to bf16 (half the pad pass / per-tile DMA); skip the pad
    # materialization entirely when shapes already align.
    if m_pad == M and k0 == K:
        x_in = x2d.astype(matmul_dtype)
    else:
        x_in = jnp.zeros((m_pad, k0), matmul_dtype).at[:M, :K].set(
            x2d.astype(matmul_dtype))

    in_specs = [pl.BlockSpec((tm, k0), lambda i: (i, 0))]
    inputs = [x_in]
    for w, b in zip(padded_weights, padded_biases):
        # Full-extent, constant index_map -> fetched once, VMEM-resident.
        # Single-buffered: no point double-buffering a block that never
        # changes across the grid.
        in_specs.append(pl.BlockSpec(w.shape, lambda i: (0, 0),
                                     pipeline_mode=pl.Buffered(1)))
        in_specs.append(pl.BlockSpec(b.shape, lambda i: (0, 0),
                                     pipeline_mode=pl.Buffered(1)))
        inputs.append(w)
        inputs.append(b)
    out_specs = pl.BlockSpec((tm, n_last), lambda i: (i, 0))

    # Precise VMEM budget: params once (single-buffered), x/out tiles
    # double-buffered, plus f32 accumulator/activation headroom.
    itemsize_x = jnp.dtype(matmul_dtype).itemsize
    bytes_params = sum(
        int(w.size) * jnp.dtype(w.dtype).itemsize + int(b.size) * 4
        for w, b in zip(padded_weights, padded_biases))
    n_max = max(int(w.shape[1]) for w in padded_weights)
    bytes_tiles = (2 * tm * k0 * itemsize_x          # x tile, double-buffered
                   + 2 * tm * n_last * 4             # out tile, double-buffered
                   + 2 * tm * n_max * 4)             # acc / activation headroom
    needed = bytes_params + bytes_tiles

    # Chip-aware cap with ~20% headroom for compiler scratch/spill buffers.
    try:
        vmem_capacity = int(pltpu.get_tpu_info().vmem_capacity_bytes)
    except Exception:
        vmem_capacity = 64 * 2**20  # conservative (v7x) fallback
    budget_cap = int(vmem_capacity * 0.8)
    # TODO(synk): fall back to a K/N-tiled (weights streamed) variant when the
    # resident-weight plan does not fit instead of asserting.
    assert needed <= budget_cap, (
        f"fused MLP VMEM plan ({needed} B) exceeds budget ({budget_cap} B); "
        "reduce hidden_dim/num_layers or tile K/N.")
    vmem_limit = min(max(int(needed * 1.5), 32 * 2**20), budget_cap)

    # Cost hint for XLA's scheduler around the custom call.
    flops = 2 * m_pad * sum(int(w.shape[0]) * int(w.shape[1])
                            for w in padded_weights)
    bytes_accessed = (int(x_in.size) * itemsize_x + bytes_params
                      + m_pad * n_last * 4)
    transcendentals = m_pad * n_last if sigmoid_output else 0

    kernel = functools.partial(_fused_mlp_kernel, num_layers=num_layers,
                               sigmoid_output=sigmoid_output,
                               matmul_dtype=matmul_dtype)

    out_pad = pl.pallas_call(
        kernel,
        out_shape=jax.ShapeDtypeStruct((m_pad, n_last), jnp.float32),
        grid=(m_pad // tm,),
        in_specs=in_specs,
        out_specs=out_specs,
        compiler_params=pltpu.CompilerParams(
            dimension_semantics=("parallel",),
            vmem_limit_bytes=vmem_limit,
        ),
        cost_estimate=pl.CostEstimate(
            flops=flops,
            bytes_accessed=bytes_accessed,
            transcendentals=transcendentals,
        ),
    )(*inputs)

    # NOTE: padded output lanes (>= output_dim) hold sigmoid(0)=0.5 when
    # sigmoid_output=True; they are sliced away here and must not be consumed.
    return out_pad[:M, :output_dim]


class MLPPallas:
    """JAX/Pallas port of the PyTorch MLP module (fused single-kernel fwd)."""

    def __init__(self, input_dim, hidden_dim, output_dim, num_layers,
                 sigmoid_output=False, key=None, matmul_dtype=jnp.bfloat16):
        self.num_layers = num_layers
        self.sigmoid_output = sigmoid_output
        self.output_dim = output_dim
        self.matmul_dtype = matmul_dtype

        dims_in = [input_dim] + [hidden_dim] * (num_layers - 1)
        dims_out = [hidden_dim] * (num_layers - 1) + [output_dim]
        if key is None:
            key = jax.random.PRNGKey(0)

        # Raw params (torch semantics, stored as (in, out) = Linear.weight^T)
        self.weights, self.biases = [], []
        # Lane-dense padded copies used by the kernel (built once at init):
        # weights pre-cast to bf16, biases kept f32 for the f32 epilogue.
        self.w_pads, self.b_pads = [], []
        for n_in, n_out in zip(dims_in, dims_out):
            key, kw, kb = jax.random.split(key, 3)
            bound = 1.0 / (n_in ** 0.5)  # mimics nn.Linear init
            w = jax.random.uniform(kw, (n_in, n_out), jnp.float32, -bound, bound)
            b = jax.random.uniform(kb, (n_out,), jnp.float32, -bound, bound)
            self.weights.append(w)
            self.biases.append(b)

            kp = _round_up(n_in, 128)
            np_ = _round_up(n_out, 128)
            wp = jnp.zeros((kp, np_), jnp.float32).at[:n_in, :n_out].set(w)
            bp = jnp.zeros((1, np_), jnp.float32).at[0, :n_out].set(b)
            self.w_pads.append(wp.astype(matmul_dtype))   # bf16 once, at init
            self.b_pads.append(bp)                        # f32 bias
        self.w_pads = [jax.device_put(w) for w in self.w_pads]
        self.b_pads = [jax.device_put(b) for b in self.b_pads]

    def __call__(self, x):
        lead_shape = x.shape[:-1]
        x2d = x.reshape(-1, x.shape[-1])
        y = fused_mlp(x2d, self.w_pads, self.b_pads,
                      num_layers=self.num_layers,
                      sigmoid_output=self.sigmoid_output,
                      output_dim=self.output_dim,
                      matmul_dtype=self.matmul_dtype)
        return y.reshape(*lead_shape, self.output_dim)


def _reference_forward(mlp: MLPPallas, x):
    """Pure-JAX reference mirroring the kernel numerics (bf16 MXU operands,
    bf16 carried activations, f32 accumulation/epilogue) and the PyTorch
    control flow."""
    dt = mlp.matmul_dtype
    y = x.reshape(-1, x.shape[-1]).astype(dt)
    for i, (w, b) in enumerate(zip(mlp.weights, mlp.biases)):
        acc = jnp.dot(y, w.astype(dt), preferred_element_type=jnp.float32) + b
        if i < mlp.num_layers - 1:
            y = jnp.maximum(acc, 0.0).astype(dt)
        else:
            y = acc
    if mlp.sigmoid_output:
        y = jax.nn.sigmoid(y)
    return y.reshape(*x.shape[:-1], mlp.output_dim)


def _reference_forward_f32(mlp: MLPPallas, x):
    """Full-f32 reference (exact PyTorch semantics) for a loose sanity check."""
    y = x.reshape(-1, x.shape[-1]).astype(jnp.float32)
    for i, (w, b) in enumerate(zip(mlp.weights, mlp.biases)):
        y = y @ w + b
        if i < mlp.num_layers - 1:
            y = jnp.maximum(y, 0.0)
    if mlp.sigmoid_output:
        y = jax.nn.sigmoid(y)
    return y.reshape(*x.shape[:-1], mlp.output_dim)


if __name__ == "__main__":
    key = jax.random.PRNGKey(0)
    k_x, k_p = jax.random.split(key)

    # Small shapes consistent with the module's usage: x: (batch, seq, input_dim)
    batch, seq = 2, 8
    input_dim, hidden_dim, output_dim, num_layers = 32, 64, 16, 3

    x = jax.random.normal(k_x, (batch, seq, input_dim), jnp.float32)

    mlp = MLPPallas(input_dim, hidden_dim, output_dim, num_layers,
                    sigmoid_output=True, key=k_p)

    out = mlp(x)
    out = jax.block_until_ready(out)
    assert out.shape == (batch, seq, output_dim), out.shape

    # Tight check vs a reference that mirrors the kernel's bf16 numerics.
    ref = _reference_forward(mlp, x)
    assert jnp.allclose(out, ref, atol=1e-4, rtol=1e-4), "mismatch vs reference"

    # Loose sanity check vs the exact-f32 PyTorch-semantics reference.
    ref_f32 = _reference_forward_f32(mlp, x)
    assert jnp.allclose(out, ref_f32, atol=5e-2, rtol=5e-2), "drift vs f32 ref"

    print("KERNEL_OK")
</pallas_src>

<mosaic_0001>
module attributes {stable_mosaic.version = 11 : i64} {
  func.func @_fused_mlp_kernel(%arg0: i32, %arg1: memref<8x128xbf16, #tpu.memory_space<vmem>>, %arg2: memref<128x128xbf16, #tpu.memory_space<vmem>>, %arg3: memref<1x128xf32, #tpu.memory_space<vmem>>, %arg4: memref<128x128xbf16, #tpu.memory_space<vmem>>, %arg5: memref<1x128xf32, #tpu.memory_space<vmem>>, %arg6: memref<128x128xbf16, #tpu.memory_space<vmem>>, %arg7: memref<1x128xf32, #tpu.memory_space<vmem>>, %arg8: memref<8x128xf32, #tpu.memory_space<vmem>>) attributes {dimension_semantics = [#tpu.dimension_semantics<parallel>], iteration_bounds = array<i64: 2>, scalar_prefetch = 0 : i64, scratch_operands = 0 : i64, tpu.core_type = #tpu.core_type<tc>, window_params = [{transform_indices = @transform_0, window_bounds = array<i64: 8, 128>}, {pipeline_mode = #tpu.pipeline_mode<synchronous>, transform_indices = @transform_1, window_bounds = array<i64: 128, 128>}, {pipeline_mode = #tpu.pipeline_mode<synchronous>, transform_indices = @transform_2, window_bounds = array<i64: 1, 128>}, {pipeline_mode = #tpu.pipeline_mode<synchronous>, transform_indices = @transform_3, window_bounds = array<i64: 128, 128>}, {pipeline_mode = #tpu.pipeline_mode<synchronous>, transform_indices = @transform_4, window_bounds = array<i64: 1, 128>}, {pipeline_mode = #tpu.pipeline_mode<synchronous>, transform_indices = @transform_5, window_bounds = array<i64: 128, 128>}, {pipeline_mode = #tpu.pipeline_mode<synchronous>, transform_indices = @transform_6, window_bounds = array<i64: 1, 128>}, {transform_indices = @transform_7, window_bounds = array<i64: 8, 128>}]} {
    %c0 = arith.constant 0 : index
    %c0_0 = arith.constant 0 : index
    %0 = vector.load %arg1[%c0, %c0_0] : memref<8x128xbf16, #tpu.memory_space<vmem>>, vector<8x128xbf16>
    %c0_1 = arith.constant 0 : index
    %c0_2 = arith.constant 0 : index
    %1 = vector.load %arg2[%c0_1, %c0_2] : memref<128x128xbf16, #tpu.memory_space<vmem>>, vector<128x128xbf16>
    %cst = arith.constant dense<0.000000e+00> : vector<8x128xf32>
    %2 = tpu.matmul %0, %1, %cst {dimension_numbers = #tpu.dot_dimension_numbers<[1], [0], [0], [1], [0, 0, 1, 1], [], []>} : vector<8x128xbf16>, vector<128x128xbf16>, vector<8x128xf32> -> vector<8x128xf32>
    %c0_3 = arith.constant 0 : index
    %c0_4 = arith.constant 0 : index
    %3 = vector.load %arg3[%c0_3, %c0_4] : memref<1x128xf32, #tpu.memory_space<vmem>>, vector<1x128xf32>
    %4 = vector.broadcast %3 : vector<1x128xf32> to vector<8x128xf32>
    %5 = arith.addf %2, %4 : vector<8x128xf32>
    %cst_5 = arith.constant 0.000000e+00 : f32
    %6 = vector.broadcast %cst_5 : f32 to vector<8x128xf32>
    %7 = arith.maximumf %5, %6 : vector<8x128xf32>
    %8 = arith.truncf %7 : vector<8x128xf32> to vector<8x128xbf16>
    %c0_6 = arith.constant 0 : index
    %c0_7 = arith.constant 0 : index
    %9 = vector.load %arg4[%c0_6, %c0_7] : memref<128x128xbf16, #tpu.memory_space<vmem>>, vector<128x128xbf16>
    %cst_8 = arith.constant dense<0.000000e+00> : vector<8x128xf32>
    %10 = tpu.matmul %8, %9, %cst_8 {dimension_numbers = #tpu.dot_dimension_numbers<[1], [0], [0], [1], [0, 0, 1, 1], [], []>} : vector<8x128xbf16>, vector<128x128xbf16>, vector<8x128xf32> -> vector<8x128xf32>
    %c0_9 = arith.constant 0 : index
    %c0_10 = arith.constant 0 : index
    %11 = vector.load %arg5[%c0_9, %c0_10] : memref<1x128xf32, #tpu.memory_space<vmem>>, vector<1x128xf32>
    %12 = vector.broadcast %11 : vector<1x128xf32> to vector<8x128xf32>
    %13 = arith.addf %10, %12 : vector<8x128xf32>
    %cst_11 = arith.constant 0.000000e+00 : f32
    %14 = vector.broadcast %cst_11 : f32 to vector<8x128xf32>
    %15 = arith.maximumf %13, %14 : vector<8x128xf32>
    %16 = arith.truncf %15 : vector<8x128xf32> to vector<8x128xbf16>
    %c0_12 = arith.constant 0 : index
    %c0_13 = arith.constant 0 : index
    %17 = vector.load %arg6[%c0_12, %c0_13] : memref<128x128xbf16, #tpu.memory_space<vmem>>, vector<128x128xbf16>
    %cst_14 = arith.constant dense<0.000000e+00> : vector<8x128xf32>
    %18 = tpu.matmul %16, %17, %cst_14 {dimension_numbers = #tpu.dot_dimension_numbers<[1], [0], [0], [1], [0, 0, 1, 1], [], []>} : vector<8x128xbf16>, vector<128x128xbf16>, vector<8x128xf32> -> vector<8x128xf32>
    %c0_15 = arith.constant 0 : index
    %c0_16 = arith.constant 0 : index
    %19 = vector.load %arg7[%c0_15, %c0_16] : memref<1x128xf32, #tpu.memory_space<vmem>>, vector<1x128xf32>
    %20 = vector.broadcast %19 : vector<1x128xf32> to vector<8x128xf32>
    %21 = arith.addf %18, %20 : vector<8x128xf32>
    %22 = arith.negf %21 : vector<8x128xf32>
    %23 = math.exp %22 : vector<8x128xf32>
    %cst_17 = arith.constant 1.000000e+00 : f32
    %24 = vector.broadcast %cst_17 : f32 to vector<8x128xf32>
    %25 = arith.addf %24, %23 : vector<8x128xf32>
    %26 = arith.divf %24, %25 : vector<8x128xf32>
    %c0_18 = arith.constant 0 : index
    %c0_19 = arith.constant 0 : index
    %27 = vector.load %arg8[%c0_18, %c0_19] : memref<8x128xf32, #tpu.memory_space<vmem>>, vector<8x128xf32>
    tpu.vector_store %arg8[%c0_18, %c0_19], %26 {strides = array<i32>} : memref<8x128xf32, #tpu.memory_space<vmem>>, vector<8x128xf32>,
    return
  }
  func.func @transform_0(%arg0: i32) -> (i32, i32) {
    %c0_i32 = arith.constant 0 : i32
    %c0_i32_0 = arith.constant 0 : i32
    return %arg0, %c0_i32 : i32, i32
  }
  func.func @transform_1(%arg0: i32) -> (i32, i32) {
    %c0_i32 = arith.constant 0 : i32
    %c0_i32_0 = arith.constant 0 : i32
    %c0_i32_1 = arith.constant 0 : i32
    return %c0_i32, %c0_i32_0 : i32, i32
  }
  func.func @transform_2(%arg0: i32) -> (i32, i32) {
    %c0_i32 = arith.constant 0 : i32
    %c0_i32_0 = arith.constant 0 : i32
    %c0_i32_1 = arith.constant 0 : i32
    return %c0_i32, %c0_i32_0 : i32, i32
  }
  func.func @transform_3(%arg0: i32) -> (i32, i32) {
    %c0_i32 = arith.constant 0 : i32
    %c0_i32_0 = arith.constant 0 : i32
    %c0_i32_1 = arith.constant 0 : i32
    return %c0_i32, %c0_i32_0 : i32, i32
  }
  func.func @transform_4(%arg0: i32) -> (i32, i32) {
    %c0_i32 = arith.constant 0 : i32
    %c0_i32_0 = arith.constant 0 : i32
    %c0_i32_1 = arith.constant 0 : i32
    return %c0_i32, %c0_i32_0 : i32, i32
  }
  func.func @transform_5(%arg0: i32) -> (i32, i32) {
    %c0_i32 = arith.constant 0 : i32
    %c0_i32_0 = arith.constant 0 : i32
    %c0_i32_1 = arith.constant 0 : i32
    return %c0_i32, %c0_i32_0 : i32, i32
  }
  func.func @transform_6(%arg0: i32) -> (i32, i32) {
    %c0_i32 = arith.constant 0 : i32
    %c0_i32_0 = arith.constant 0 : i32
    %c0_i32_1 = arith.constant 0 : i32
    return %c0_i32, %c0_i32_0 : i32, i32
  }
  func.func @transform_7(%arg0: i32) -> (i32, i32) {
    %c0_i32 = arith.constant 0 : i32
    %c0_i32_0 = arith.constant 0 : i32
    return %arg0, %c0_i32 : i32, i32
  }
}

</mosaic_0001>

<bundles_post_ra>
// kernel: tpu_custom_call.1
= control target key start
LH: loop header
LB: loop body
LE: loop exit
PB: predicated region body
PF: predicated region fallthrough
CT: control target
= control target key end

     0   :  { %12 = vsyncpa [#allocation3], 0  ;;  %s1584_s0 = inlined_call_operand.hbm [shape: bf16[16,128], index: 0, kind: input, shape index: {}]   ;;  %s1585_s1 = inlined_call_operand.hbm [shape: bf16[128,128], index: 1, kind: input, shape index: {}]   ;;  %s1586_s2 = inlined_call_operand.vmem [shape: f32[1,128], index: 2, kind: input, shape index: {}]   ;;  %s1587_s3 = inlined_call_operand.hbm [shape: bf16[128,128], index: 3, kind: input, shape index: {}]   ;;  %s1588_s4 = inlined_call_operand.vmem [shape: f32[1,128], index: 4, kind: input, shape index: {}]   ;;  %s1589_s5 = inlined_call_operand.hbm [shape: bf16[128,128], index: 5, kind: input, shape index: {}]   ;;  %s1590_s6 = inlined_call_operand.vmem [shape: f32[1,128], index: 6, kind: input, shape index: {}]   ;;  %s1591_s7 = inlined_call_operand.hbm [shape: f32[16,128], index: 7, kind: output, shape index: {}]  }
   0x1   :  { %14 = vsyncpa [#allocation3 + $0x1], 0 }
   0x2   :  { %15 = vsyncpa [#allocation6], 0 }
   0x3   :  { %16 = vsyncpa [#allocation9], 0 }
   0x4   :  { %17 = vsyncpa [#allocation4], 0 }
   0x5   :  { %19 = vsyncpa [#allocation4 + $0x1], 0  ;;  %s1278_s24 = smov 0   ;;  %s1280_s25 = smov 0  }
   0x6   :  { %s1282_s26 = smov 0   ;;  %s1284_s27 = smov 0  }
   0x7 LB: > { %s1299_s28 = sadd.s32 4294967295, %s1227_s27   ;;  %s797_s29 = sadd.s32 4294967294, %s1227_s27   ;;  %s1227_s27 = sphi %s1284_s27, %s1617_s27   ;;  %s1223_s26 = sphi %s1282_s26, %s1616_s26   ;;  %s1219_s25 = sphi %s1280_s25, %s1615_s25   ;;  %s1215_s24 = sphi %s1278_s24, %s1614_s24  }
   0x8   : > { %p45_p0 = scmp.ne.s32.totalorder %s1219_s25, %s1215_s24  ;;  %p1592_p1 = scmp.eq.s32.totalorder %s1299_s28, 0 }
   0x9   : > { %p201_p3 = scmp.eq.s32.totalorder %s797_s29, 1  ;;  %p798_p5 = scmp.ge.s32.totalorder %s1227_s27, 1 }
   0xa   : > { %p1308_p4 = por %p1592_p1, %p45_p0  ;;  %p208_p7 = scmp.lt.s32.totalorder %s1227_s27, 3 }
   0xb   : > { %p1313_p6 = por %p201_p3, %p45_p0  ;;  %s1229_s10 = smov [#allocation5]  }
   0xc   : > { %s1596_s30 = scalar_select %p1308_p4, 1, 0 }
   0xd   : > { %s1597_s8 = scalar_select %p1313_p6, 1, 0 }
   0xe   : > { %p1318_p8 = pnand %p798_p5, %p208_p7  ;;  %s220_s11 = sshll.u32 %s1229_s10, 4  ;;  %s1322_s11 = int_to_ptr.vmem [resolvable:$true] %s220_s11 }
   0xf   : > { %1598 = sst [smem:[#allocation15_spill]] %s1597_s8  ;;  %s1230_s13 = smov [#allocation7]  }
  0x10   : > { %s1599_s9 = scalar_select %p1318_p8, 1, 0 }
  0x11   : > { %p946_p9 = pneg %p1318_p8  ;;  %s236_s14 = sshll.u32 %s1230_s13, 4  ;;  %s1333_s14 = int_to_ptr.vmem [resolvable:$true] %s236_s14 }
  0x12   : > { %s1231_s15 = smov [#allocation8]   ;;  %s1039_s19 = scalar_lea.hbm %s1585_s1, 1024 }
  0x13   : > { %p1329_p11 = pnand %p946_p9, %p1592_p1  ;;  %s1335_s16 = sshll.u32 %s1231_s15, 4  ;;  %s253_s16 = int_to_ptr.vmem [resolvable:$true] %s1335_s16 }
  0x14   : > { %p1040_p12 = scmp.ne.s32.totalorder %s1585_s1, %s1039_s19  ;;  %p1046_p5 = scmp.lt.u32.totalorder %s1039_s19, %s1585_s1 }
  0x15   : > { %p1345_p13 = pneg %p1329_p11 }
  0x17   : > { %p1042_p0 = pnand %p1345_p13, %p1040_p12 }
  0x19   : > { %p1043_p3 = pneg %p1042_p0 }
  0x1b   : > { %p1048_p7 = pnand %p1046_p5, %p1043_p3 }
  0x1d   : > { %1051 = shalt.err (!%p1048_p7)
}
  0x1e   : > { %s1052_s10 = scalar_lea.vmem %s1322_s11, 1024  ;;  %p1060_p2 = scmp.lt.s32.totalorder %s1322_s11, %s1322_s11 }
  0x1f   : > { %p1053_p9 = scmp.ne.s32.totalorder %s1322_s11, %s1052_s10  ;;  %p1061_p6 = scmp.lt.s32.totalorder %s1052_s10, %s1052_s10 }
  0x21   : > { %p1055_p10 = pnand %p1053_p9, %p1345_p13  ;;  %p1062_p12 = por %p1061_p6, %p1060_p2 }
  0x23   : > { %p1056_p1 = pneg %p1055_p10 }
  0x25   : > { %p1063_p0 = pnand %p1062_p12, %p1056_p1 }
  0x27   : > { %1066 = shalt.err (!%p1063_p0)
}
  0x28   : > { %s1232_s13 = smov 64   ;;  %s1233_s15 = smov 4  }
  0x29   : > { %949 = dma.hbm_to_vmem [thread:$0]  (!%p1329_p11), %s1585_s1, 1024, %s1322_s11, [#allocation6], %s1232_s13, %s1232_s13, %s1233_s15  }
  0x2a   : > { %s1067_s21 = scalar_lea.hbm %s1587_s3, 1024 }
  0x2b   : > { %p1068_p1 = scmp.ne.s32.totalorder %s1587_s3, %s1067_s21  ;;  %p1074_p10 = scmp.lt.u32.totalorder %s1067_s21, %s1587_s3 }
  0x2d   : > { %p1070_p2 = pnand %p1068_p1, %p1345_p13 }
  0x2f   : > { %p1071_p6 = pneg %p1070_p2 }
  0x31   : > { %p1076_p3 = pnand %p1074_p10, %p1071_p6 }
  0x33   : > { %1079 = shalt.err (!%p1076_p3)
}
  0x34   : > { %s1080_s11 = scalar_lea.vmem %s1333_s14, 1024  ;;  %p1088_p12 = scmp.lt.s32.totalorder %s1333_s14, %s1333_s14 }
  0x35   : > { %p1081_p5 = scmp.ne.s32.totalorder %s1333_s14, %s1080_s11  ;;  %p1089_p0 = scmp.lt.s32.totalorder %s1080_s11, %s1080_s11 }
  0x37   : > { %p1083_p7 = pnand %p1081_p5, %p1345_p13  ;;  %p1090_p1 = por %p1089_p0, %p1088_p12 }
  0x39   : > { %p1084_p9 = pneg %p1083_p7 }
  0x3b   : > { %p1091_p2 = pnand %p1090_p1, %p1084_p9 }
  0x3d   : > { %1094 = shalt.err (!%p1091_p2)
}
  0x3e   : > { %952 = dma.hbm_to_vmem [thread:$0]  (!%p1329_p11), %s1587_s3, 1024, %s1333_s14, [#allocation6], %s1232_s13, %s1232_s13, %s1233_s15  }
  0x3f   : > { %s1095_s20 = scalar_lea.hbm %s1589_s5, 1024 }
  0x40   : > { %p1096_p6 = scmp.ne.s32.totalorder %s1589_s5, %s1095_s20  ;;  %p1102_p5 = scmp.lt.u32.totalorder %s1095_s20, %s1589_s5 }
  0x42   : > { %p1098_p10 = pnand %p1096_p6, %p1345_p13 }
  0x44   : > { %p1099_p3 = pneg %p1098_p10 }
  0x46   : > { %p1104_p7 = pnand %p1102_p5, %p1099_p3 }
  0x48   : > { %1107 = shalt.err (!%p1104_p7)
}
  0x49   : > { %s1108_s11 = scalar_lea.vmem %s253_s16, 1024  ;;  %p1116_p1 = scmp.lt.s32.totalorder %s253_s16, %s253_s16 }
  0x4a   : > { %p1109_p9 = scmp.ne.s32.totalorder %s253_s16, %s1108_s11  ;;  %p1117_p2 = scmp.lt.s32.totalorder %s1108_s11, %s1108_s11 }
  0x4c   : > { %p1111_p12 = pnand %p1109_p9, %p1345_p13  ;;  %p1118_p4 = por %p1117_p2, %p1116_p1 }
  0x4e   : > { %p1112_p0 = pneg %p1111_p12 }
  0x50   : > { %p1119_p8 = pnand %p1118_p4, %p1112_p0 }
  0x52   : > { %1122 = shalt.err (!%p1119_p8)
}
  0x53   : > { %955 = dma.hbm_to_vmem [thread:$0]  (!%p1329_p11), %s1589_s5, 1024, %s253_s16, [#allocation9], %s1232_s13, %s1232_s13, %s1233_s15  }
  0x54   : > { %s1418_s22 = sadd.s32 1, %s1227_s27   ;;  %s32_s17 = sadd.s32 1, %s1223_s26 }
  0x55   : > { %s29_s12 = ssub.s32 %s1227_s27, %s1418_s22  ;;  %p39_p8 = scmp.ne.s32.totalorder %s1223_s26, %s1219_s25 }
  0x56   : > { %p30_p4 = scmp.eq.s32.totalorder %s29_s12, 0  ;;  %p40_p13 = scmp.eq.s32.totalorder %s1227_s27, 0 }
  0x57   : > { %p967_p6 = scmp.lt.s32.totalorder %s1227_s27, 2  ;;  %p1602_p3 = scmp.eq.s32.totalorder %s1299_s28, 1 }
  0x58   : > { %s1428_s18 = scalar_select %p30_p4, %s1223_s26, %s32_s17  }
  0x59   : > { %p41_p10 = por %p40_p13, %p39_p8  ;;  %p1432_p5 = por %p1602_p3, %p39_p8 }
  0x5a   : > { %s269_s20 = sand.u32 1, %s1223_s26   ;;  %s804_s21 = sshll.u32 %s1227_s27, 6 }
  0x5b   : > { %s803_s16 = sshll.u32 %s269_s20, 2  ;;  %s1441_s23 = scalar_lea.hbm %s1584_s0, %s804_s21 }
  0x5c   : > { %s273_s29 = scalar_lea.vmem [#allocation2], %s803_s16  ;;  %p1443_p11 = pnand %p967_p6, %p41_p10 }
  0x5d   : > { %s280_s10 = sshll.u32 %s273_s29, 4  ;;  %s270_s14 = scalar_lea.sflag [#allocation3], %s269_s20  ;;  %s1447_s10 = int_to_ptr.vmem [resolvable:$true] %s280_s10 }
  0x5e   : > { %s1123_s8 = scalar_lea.hbm %s1441_s23, 64  ;;  %p1125_p9 = pneg %p1443_p11 }
  0x5f   : > { %p1124_p7 = scmp.ne.s32.totalorder %s1441_s23, %s1123_s8  ;;  %s1128_s21 = scalar_lea.hbm %s1584_s0, 128 }
  0x60   : > { %p1129_p1 = scmp.lt.u32.totalorder %s1441_s23, %s1584_s0  ;;  %p1130_p2 = scmp.lt.u32.totalorder %s1128_s21, %s1123_s8 }
  0x61   : > { %p1126_p12 = pnand %p1125_p9, %p1124_p7  ;;  %p1132_p8 = scmp.lt.u32.totalorder %s1123_s8, %s1441_s23 }
  0x62   : > { %p1131_p4 = por %p1130_p2, %p1129_p1 }
  0x63   : > { %p1127_p0 = pneg %p1126_p12 }
  0x64   : > { %p1133_p13 = por %p1132_p8, %p1131_p4 }
  0x66   : > { %p1134_p6 = pnand %p1133_p13, %p1127_p0 }
  0x68   : > { %1137 = shalt.err (!%p1134_p6)
}
  0x69   : > { %s1138_s20 = scalar_lea.vmem %s1447_s10, 64  ;;  %s1234_s15 = smov [#allocation2]  }
  0x6a   : > { %p1139_p10 = scmp.ne.s32.totalorder %s1447_s10, %s1138_s20  ;;  %s1143_s29 = sshll.u32 %s1234_s15, 4  ;;  %s1144_s29 = int_to_ptr.vmem [resolvable:$false] %s1143_s29 }
  0x6b   : > { %s1145_s12 = scalar_lea.vmem %s1144_s29, 128  ;;  %p1146_p12 = scmp.lt.s32.totalorder %s1447_s10, %s1144_s29 }
  0x6c   : > { %p1141_p3 = pnand %p1139_p10, %p1125_p9  ;;  %p1147_p1 = scmp.lt.s32.totalorder %s1145_s12, %s1138_s20 }
  0x6e   : > { %p1142_p7 = pneg %p1141_p3  ;;  %p1148_p2 = por %p1147_p1, %p1146_p12 }
  0x70   : > { %p1149_p4 = pnand %p1148_p2, %p1142_p7 }
  0x72   : > { %1152 = shalt.err (!%p1149_p4)
}
  0x73   : > { %959 = dma.hbm_to_vmem [thread:$0]  (!%p1443_p11), %s1441_s23, 64, %s1447_s10, %s270_s14  }
  0x74   : > { %p1605_p0 = scmp.ne.s32.totalorder %s1599_s9, 0 }
  0x75   : > { %s1477_s8 = sand.u32 (!%p1605_p0), 1, %s1219_s25   ;;  %p1606_p9 = scmp.ne.s32.totalorder (!%p1605_p0), %s1596_s30, 0 }
  0x76   : > { %289 = sbr.rel (%p1605_p0) target bundleno = 857 (0x359), region = 48  ;;  %s806_s17 = sshll.u32 (!%p1605_p0), %s1477_s8, 2 }
  0x77   : > { %s292_s21 = scalar_lea.sflag (!%p1605_p0), [#allocation3], %s1477_s8  ;;  %s1481_s16 = scalar_lea.vmem (!%p1605_p0), [#allocation2], %s806_s17 }
  0x7d   : > { %1198 = dma.done.wait (%p1606_p9), %s292_s21, 64  }
  0x7e   : > { %1200 = vsyncadd (%p1606_p9), %s292_s21, 4294967232  ;;  %p1607_p11 = scmp.eq.s32.totalorder %s1299_s28, 0 }
  0x80   : > { %1202 = dma.done.wait (%p1607_p11), [#allocation6], 2048   ;;  %p1608_p8 = pmov %p1607_p11 }
  0x82   : > { %1204 = vsyncadd (%p1608_p8), [#allocation6], 4294965248  ;;  %p1609_p13 = pmov %p1608_p8 }
  0x83   : > { %p1610_p6 = pmov %p1608_p8 }
  0x84   : > { %1206 = dma.done.wait (%p1609_p13), [#allocation9], 1024  }
  0x85   : > { %1208 = vsyncadd (%p1610_p6), [#allocation9], 4294966272  ;;  %v1235_v0 = vmov 0.0   ;;  %vm1236_vm0 = vmmov 0   ;;  %v1011_v1 = vld [vmem:[#allocation5] sm:$0xff]   ;;  %v1012_v2 = vld [vmem:[#allocation5 + $0x8] sm:$0xff]  }
  0x86   : > { %870 = vmatprep.subr.bf16.mxu0 %v1235_v0  ;;  %886 = vmatprep.mubr.msk.bf16.mxu0 %vm1236_vm0, %v1235_v0  ;;  %v1013_v3 = vld [vmem:[#allocation5 + $0x10] sm:$0xff]   ;;  %v1019_v4 = vld [vmem:[#allocation7] sm:$0xff]   ;;  %v1014_v5 = vld [vmem:[#allocation5 + $0x18] sm:$0xff]   ;;  %s810_s13 = sshll.u32 %s1477_s8, 3  ;;  %s840_s20 = sshll.u32 %s1299_s28, 7 }
  0x87   : > { %890 = vmatprep.subr.bf16.mxu1 %v1235_v0  ;;  %906 = vmatprep.mubr.msk.bf16.mxu1 %vm1236_vm0, %v1235_v0  ;;  %v1020_v6 = vld [vmem:[#allocation7 + $0x8] sm:$0xff]   ;;  %v1015_v7 = vld [vmem:[#allocation5 + $0x20] sm:$0xff]   ;;  %v1021_v8 = vld [vmem:[#allocation7 + $0x10] sm:$0xff]   ;;  %s337_s15 = scalar_lea.vmem [#allocation10], %s810_s13  ;;  %s1540_s21 = scalar_lea.hbm %s1591_s7, %s840_s20 }
  0x88   : > { %871 = vmatpush3.bf16.msra.mxu0 %v1011_v1  ;;  %891 = vmatpush3.bf16.msra.mxu1 %v1019_v4  ;;  %v1016_v9 = vld [vmem:[#allocation5 + $0x28] sm:$0xff]   ;;  %v1022_v10 = vld [vmem:[#allocation7 + $0x18] sm:$0xff]   ;;  %v1017_v11 = vld [vmem:[#allocation5 + $0x30] sm:$0xff]   ;;  %s698_s29 = sshll.u32 %s337_s15, 4  ;;  %s1237_s28 = smov [#allocation10]   ;;  %s1542_s29 = int_to_ptr.vmem [resolvable:$true] %s698_s29 }
  0x89   : > { %872 = vmatprep.subr.bf16.mxu0 %v1235_v0  ;;  %892 = vmatprep.subr.bf16.mxu1 %v1235_v0  ;;  %v1023_v12 = vld [vmem:[#allocation7 + $0x20] sm:$0xff]   ;;  %v1018_v13 = vld [vmem:[#allocation5 + $0x38] sm:$0xff]   ;;  %v1024_v14 = vld [vmem:[#allocation7 + $0x28] sm:$0xff]   ;;  %s1153_s30 = scalar_lea.vmem %s1542_s29, 128  ;;  %s1157_s9 = sshll.u32 %s1237_s28, 4  ;;  %s1158_s9 = int_to_ptr.vmem [resolvable:$false] %s1157_s9 }
  0x8a   : > { %v339_v15 = vld [vmem:[%s1481_s16] sm:$0xf]  ;;  %v1025_v16 = vld [vmem:[#allocation7 + $0x30] sm:$0xff]   ;;  %v1027_v18 = vld [vmem:[#allocation8] sm:$0xff]   ;;  %s685_s16 = scalar_lea.sflag [#allocation4], %s1477_s8  ;;  %p1154_p10 = scmp.ne.s32.totalorder %s1542_s29, %s1153_s30 }
  0x8b   : > { %v1026_v17 = vld [vmem:[#allocation7 + $0x38] sm:$0xff]   ;;  %v1028_v19 = vld [vmem:[#allocation8 + $0x8] sm:$0xff]   ;;  %v1029_v20 = vld [vmem:[#allocation8 + $0x10] sm:$0xff]   ;;  %s1159_s23 = scalar_lea.vmem %s1158_s9, 256  ;;  %p1160_p12 = scmp.lt.s32.totalorder %s1542_s29, %s1158_s9 }
  0x8c   : > { %873 = vmatpush3.bf16.msra.mxu0 %v1012_v2  ;;  %893 = vmatpush3.bf16.msra.mxu1 %v1020_v6  ;;  %v1030_v21 = vld [vmem:[#allocation8 + $0x18] sm:$0xff]   ;;  %v1031_v22 = vld [vmem:[#allocation8 + $0x20] sm:$0xff]   ;;  %v1032_v23 = vld [vmem:[#allocation8 + $0x28] sm:$0xff]   ;;  %p1155_p3 = pnand %p1154_p10, %p1432_p5  ;;  %p1161_p1 = scmp.lt.s32.totalorder %s1159_s23, %s1153_s30 }
  0x8d   : > { %874 = vmatprep.subr.bf16.mxu0 %v1235_v0  ;;  %894 = vmatprep.subr.bf16.mxu1 %v1235_v0  ;;  %v811_v24 = vld [vmem:[%s1586_s2] ss:$0 sm:$0xff]  ;;  %v1033_v32 = vld [vmem:[#allocation8 + $0x30] sm:$0xff]  }
  0x8e   : > { %v1034_v33 = vld [vmem:[#allocation8 + $0x38] sm:$0xff]   ;;  %p1156_p7 = pneg %p1155_p3  ;;  %p1162_p2 = por %p1161_p1, %p1160_p12 }
  0x8f   : > { %v820_v34 = vld [vmem:[%s1588_s4] ss:$0 sm:$0xff] }
  0x90   : > { %875 = vmatpush3.bf16.msra.mxu0 %v1013_v3  ;;  %895 = vmatpush3.bf16.msra.mxu1 %v1021_v8  ;;  %v829_v42 = vld [vmem:[%s1590_s6] ss:$0 sm:$0xff]  ;;  %p1163_p4 = pnand %p1162_p2, %p1156_p7 }
  0x91   : > { %876 = vmatprep.subr.bf16.mxu0 %v1235_v0  ;;  %896 = vmatprep.subr.bf16.mxu1 %v1235_v0 }
  0x94   : > { %877 = vmatpush3.bf16.msra.mxu0 %v1014_v5  ;;  %897 = vmatpush3.bf16.msra.mxu1 %v1022_v10 }
  0x95   : > { %878 = vmatprep.subr.bf16.mxu0 %v1235_v0  ;;  %898 = vmatprep.subr.bf16.mxu1 %v1235_v0 }
  0x98   : > { %879 = vmatpush3.bf16.msra.mxu0 %v1015_v7  ;;  %899 = vmatpush3.bf16.msra.mxu1 %v1023_v12 }
  0x99   : > { %880 = vmatprep.subr.bf16.mxu0 %v1235_v0  ;;  %900 = vmatprep.subr.bf16.mxu1 %v1235_v0 }
  0x9c   : > { %881 = vmatpush3.bf16.msra.mxu0 %v1016_v9  ;;  %901 = vmatpush3.bf16.msra.mxu1 %v1024_v14 }
  0x9d   : > { %882 = vmatprep.subr.bf16.mxu0 %v1235_v0  ;;  %902 = vmatprep.subr.bf16.mxu1 %v1235_v0 }
  0xa0   : > { %883 = vmatpush3.bf16.msra.mxu0 %v1017_v11  ;;  %903 = vmatpush3.bf16.msra.mxu1 %v1025_v16 }
  0xa1   : > { %884 = vmatprep.subr.bf16.mxu0 %v1235_v0  ;;  %904 = vmatprep.subr.bf16.mxu1 %v1235_v0 }
  0xa4   : > { %885 = vmatpush3.bf16.msra.mxu0 %v1018_v13  ;;  %905 = vmatpush3.bf16.msra.mxu1 %v1026_v17 }
  0xa5   : > { %910 = vmatprep.subr.bf16.mxu0 %v1235_v0 }
  0xa7   : > { %887 = vmatmul.mubr.bf16.vlgmr.msra.gmra.mrb[0].mxu0 %v339_v15 }
  0xa8   : > { %926 = vmatprep.mubr.msk.bf16.mxu0 %vm1236_vm0, %v1235_v0  ;;  %911 = vmatpush3.bf16.msra.mxu0 %v1027_v18 }
  0xa9   : > { %912 = vmatprep.subr.bf16.mxu0 %v1235_v0 }
  0xac   : > { %913 = vmatpush3.bf16.msra.mxu0 %v1028_v19 }
  0xad   : > { %914 = vmatprep.subr.bf16.mxu0 %v1235_v0 }
  0xb0   : > { %915 = vmatpush3.bf16.msra.mxu0 %v1029_v20 }
  0xb1   : > { %916 = vmatprep.subr.bf16.mxu0 %v1235_v0 }
  0xb4   : > { %917 = vmatpush3.bf16.msra.mxu0 %v1030_v21 }
  0xb5   : > { %918 = vmatprep.subr.bf16.mxu0 %v1235_v0 }
  0xb8   : > { %919 = vmatpush3.bf16.msra.mxu0 %v1031_v22 }
  0xb9   : > { %920 = vmatprep.subr.bf16.mxu0 %v1235_v0 }
  0xbc   : > { %921 = vmatpush3.bf16.msra.mxu0 %v1032_v23 }
  0xbd   : > { %922 = vmatprep.subr.bf16.mxu0 %v1235_v0 }
  0xc0   : > { %923 = vmatpush3.bf16.msra.mxu0 %v1033_v32 }
  0xc1   : > { %924 = vmatprep.subr.bf16.mxu0 %v1235_v0 }
  0xc4   : > { %925 = vmatpush3.bf16.msra.mxu0 %v1034_v33 }
 0x17a   : > { %v445_v25 = vpop.f32.mrb[0].mxu0 }
 0x17b   : > { %v446_v26 = vadd.f32 %v811_v24, %v445_v25  ;;  %v888_v27 = vpop.f32.mrb[1].mxu0 }
 0x17c   : > { %v448_v28 = vpop.f32.mrb[2].mxu0 }
 0x17d   : > { %v451_v29 = vmax.f32 %v446_v26, 0.0  ;;  %v889_v30 = vpop.f32.mrb[3].mxu0 }
 0x17f   : > { %v452_v31 = vpack.c.bf16 %v451_v29, %v451_v29 }
 0x181   : > { %907 = vmatmul.mubr.bf16.vlgmr.msra.gmra.mrb[0].mxu1 %v452_v31 }
 0x254   : > { %v558_v35 = vpop.f32.mrb[0].mxu1 }
 0x255   : > { %v559_v36 = vadd.f32 %v820_v34, %v558_v35  ;;  %v908_v37 = vpop.f32.mrb[1].mxu1 }
 0x256   : > { %v561_v38 = vpop.f32.mrb[2].mxu1 }
 0x257   : > { %v564_v39 = vmax.f32 %v559_v36, 0.0  ;;  %v909_v40 = vpop.f32.mrb[3].mxu1 }
 0x259   : > { %v565_v41 = vpack.c.bf16 %v564_v39, %v564_v39 }
 0x25b   : > { %927 = vmatmul.mubr.bf16.vlgmr.msra.gmra.mrb[4].mxu0 %v565_v41 }
 0x32e   : > { %v671_v43 = vpop.f32.mrb[4].mxu0 }
 0x32f   : > { %v672_v44 = vadd.f32 %v829_v42, %v671_v43  ;;  %v928_v45 = vpop.f32.mrb[5].mxu0 }
 0x330   : > { %v674_v46 = vpop.f32.mrb[6].mxu0 }
 0x331   : > { %v838_v47 = vmul.f32 -1.442695, %v672_v44  ;;  %v929_v48 = vpop.f32.mrb[7].mxu0 }
 0x333   : > { %1035 = vpow2.f32 %v838_v47 }
 0x33d   : > { %v1036_v49 = vpop.eup %1035 }
 0x33e   : > { %v680_v50 = vadd.f32 1.0, %v1036_v49 }
 0x340   : > { %1037 = vrcp.f32 %v680_v50 }
 0x34a   : > { %v1038_v51 = vpop.eup %1037 }
 0x34b   : > { %683 = vst [vmem:[%s337_s15] sm:$0xff] %v1038_v51 }
 0x34c   : > { %1166 = shalt.err (!%p1163_p4)
}
 0x34d   : > { %s1167_s8 = scalar_lea.hbm %s1540_s21, 128  ;;  %s1171_s14 = scalar_lea.hbm %s1591_s7, 256 }
 0x34e   : > { %p1168_p0 = scmp.ne.s32.totalorder %s1540_s21, %s1167_s8  ;;  %p1172_p8 = scmp.lt.u32.totalorder %s1540_s21, %s1591_s7 }
 0x34f   : > { %p1173_p13 = scmp.lt.u32.totalorder %s1171_s14, %s1167_s8  ;;  %p1175_p10 = scmp.lt.u32.totalorder %s1167_s8, %s1540_s21 }
 0x350   : > { %p1169_p9 = pnand %p1168_p0, %p1432_p5 }
 0x351   : > { %p1174_p6 = por %p1173_p13, %p1172_p8 }
 0x352   : > { %p1170_p11 = pneg %p1169_p9 }
 0x353   : > { %p1176_p3 = por %p1175_p10, %p1174_p6 }
 0x355   : > { %p1177_p7 = pnand %p1176_p3, %p1170_p11 }
 0x357   : > { %1180 = shalt.err (!%p1177_p7)
}
 0x358   : > { %944 = dma.vmem_to_hbm [thread:$0]  (%p1432_p5), %s1542_s29, 128, %s1540_s21, %s685_s16  }
 0x359 PF: > { %s1611_s15 = sld [smem:[#allocation15_spill]]  ;;  %s710_s12 = sand.u32 1, %s1215_s24  }
 0x35a   : > { %p1613_p1 = scmp.ge.s32.totalorder %s1227_s27, 2  ;;  %s711_s17 = scalar_lea.sflag [#allocation4], %s710_s12 }
 0x35f   : > { %p1612_p12 = scmp.ne.s32.totalorder %s1611_s15, 0 }
 0x361   : > { %p961_p2 = pnand %p1613_p1, %p1612_p12 }
 0x363   : > { %1210 = dma.done.wait (!%p961_p2), %s711_s17, 128  }
 0x364   : > { %1212 = vsyncadd (!%p961_p2), %s711_s17, 4294967168  ;;  %p22_p4 = scmp.ge.s32.totalorder %s1418_s22, 4   ;;  %s1614_s24 = smov %s1219_s25 }
 0x365   : > { %s1615_s25 = smov %s1223_s26  ;;  %s1616_s26 = smov %s1428_s18 }
 0x366   : > { %s1617_s27 = smov %s1418_s22  ;;  %24 = sbr.rel (!%p22_p4) target bundleno = 7 (0x7), region = 105 }
 0x36d   :  { %716 = vsyncpa [#allocation3], 1 }
 0x36e   :  { %718 = vsyncpa [#allocation3 + $0x1], 1 }
 0x36f   :  { %719 = vsyncpa [#allocation6], 1 }
 0x370   :  { %720 = vsyncpa [#allocation9], 1 }
 0x371   :  { %721 = vsyncpa [#allocation4], 1 }
 0x372   :  { %723 = vsyncpa [#allocation4 + $0x1], 1 }

</bundles_post_ra>
